<compile_context>
chip_gen: v6e
topology: v6e:2x2x1
jax: 0.10.0
libtpu: 0.0.40
codegen_flags: <defaults>
</compile_context>

<pallas_src>
import jax
import jax.numpy as jnp
from jax.experimental import pallas as pl
from jax.experimental.pallas import tpu as pltpu


def _critic_kernel(s_ref, a_ref, w1_ref, w2_ref, b_ref, o_ref, x_ref):
    """One batch tile of the critic MLP.

    b_ref is a packed f32 slab (8, >=128):
      row 0, lanes [:H] -> fc1 bias
      row 1, lanes [:H] -> fc2 bias
      row 2, lanes [:H] -> fc3 weight (as a row; fc3 runs on the VPU/XLU)
      row 3, lane 0     -> fc3 bias
    x_ref is a (TB, state_dim + action_dim) VMEM scratch used to assemble the
    concatenated fc1 input without any HBM round-trip.
    """
    SD = s_ref.shape[1]
    AD = a_ref.shape[1]
    H = w2_ref.shape[0]

    # Assemble concat([state, action], dim=1) in VMEM: two lane-offset stores,
    # then a single MXU pass over the (TB, SD+AD) LHS (instead of two dots).
    x_ref[:, :SD] = s_ref[...]
    x_ref[:, SD:SD + AD] = a_ref[...]
    x = x_ref[...].astype(w1_ref.dtype)

    # fc1 + ReLU (f32 accumulation on the MXU).
    h1 = jnp.dot(x, w1_ref[...], preferred_element_type=jnp.float32)
    h1 = jnp.maximum(h1 + b_ref[0:1, :H], 0.0)

    # fc2 + ReLU.
    h2 = jnp.dot(h1.astype(w2_ref.dtype), w2_ref[...],
                 preferred_element_type=jnp.float32)
    h2 = jnp.maximum(h2 + b_ref[1:2, :H], 0.0)

    # fc3 (H -> 1): VPU multiply + cross-lane reduction instead of an N=1 matmul.
    q = jnp.sum(h2 * b_ref[2:3, :H], axis=-1, keepdims=True) + b_ref[3:4, 0:1]
    o_ref[...] = q.astype(o_ref.dtype)


def prepare_critic_params(params, *, param_dtype=jnp.bfloat16):
    """One-time preprocessing (outside the hot path).

    * W1 is kept whole (fc1 is a single MXU pass against an in-VMEM concat).
    * W1 / W2 are stored in `param_dtype` (bf16 by default); dots accumulate f32.
    * b1, b2, the fc3 weight row and the fc3 bias are packed into one resident
      (8, >=128) f32 slab so a single tiny operand stays in VMEM.
    """
    w1, b1, w2, b2, w3, b3 = params
    H = w1.shape[1]
    assert w3.shape[1] == 1, "fc3 head is assumed to have output dim 1"
    lane_w = max(128, ((H + 127) // 128) * 128)
    slab = jnp.zeros((8, lane_w), jnp.float32)
    slab = slab.at[0, :H].set(b1.reshape(-1))      # fc1 bias
    slab = slab.at[1, :H].set(b2.reshape(-1))      # fc2 bias
    slab = slab.at[2, :H].set(w3.reshape(-1))      # fc3 weight as a row (VPU path)
    slab = slab.at[3, 0].set(b3.reshape(-1)[0])    # fc3 bias scalar
    return (w1.astype(param_dtype), w2.astype(param_dtype), slab)


def _num_tensorcores():
    """Best-effort probe: 2 on v7x (2 TensorCores/chip), else 1 (v5e / v6e)."""
    try:
        kind = jax.devices()[0].device_kind.lower()
    except Exception:
        return 1
    return 2 if "v7" in kind else 1


def critic_forward(state, action, prepared_params, *, max_block_rows=2048,
                   num_batch_tiles=None):
    """Pallas implementation of Critic.forward(state, action) -> (B, 1)."""
    w1, w2, slab = prepared_params
    B, state_dim = state.shape
    action_dim = action.shape[1]
    if w1.shape[0] != state_dim + action_dim:
        raise ValueError("W1 rows must equal state_dim + action_dim")

    if num_batch_tiles is None:
        num_batch_tiles = _num_tensorcores()

    # Generation-aware batch tiling: single step on 1-TC chips, >= 2 parallel
    # steps on v7x, hard cap so lane-padded double-buffered blocks stay small.
    n_tiles = max(num_batch_tiles, pl.cdiv(B, max_block_rows))
    TB = ((pl.cdiv(B, n_tiles) + 7) // 8) * 8
    if TB >= B:
        TB = B            # single step: block equals the full batch dim (always legal)
    grid = (pl.cdiv(B, TB),)
    # NOTE: if B % TB != 0 the last tile computes on padded rows; safe because
    # rows are independent and out-of-range output rows are dropped.

    # Weights / slab: constant block index -> DMA'd once, resident in VMEM.
    resident = lambda a: pl.BlockSpec(a.shape, lambda i: (0, 0))

    return pl.pallas_call(
        _critic_kernel,
        out_shape=jax.ShapeDtypeStruct((B, 1), jnp.float32),
        grid=grid,
        in_specs=[
            pl.BlockSpec((TB, state_dim), lambda i: (i, 0)),    # state row tile
            pl.BlockSpec((TB, action_dim), lambda i: (i, 0)),   # action row tile
            resident(w1),
            resident(w2),
            resident(slab),
        ],
        out_specs=pl.BlockSpec((TB, 1), lambda i: (i, 0)),
        scratch_shapes=[pltpu.VMEM((TB, state_dim + action_dim), jnp.float32)],
        compiler_params=pltpu.CompilerParams(
            dimension_semantics=("parallel",),   # v7x: shard batch tiles over both TCs
        ),
    )(state, action, w1, w2, slab)


def init_critic_params(key, state_dim, action_dim, hidden_size=64):
    """Deterministic init mimicking nn.Linear's uniform(-1/sqrt(fan_in), +...)."""
    dims = [(state_dim + action_dim, hidden_size),
            (hidden_size, hidden_size),
            (hidden_size, 1)]
    params = []
    for (fan_in, fan_out) in dims:
        key, kw, kb = jax.random.split(key, 3)
        bound = 1.0 / jnp.sqrt(fan_in)
        w = jax.random.uniform(kw, (fan_in, fan_out), jnp.float32, -bound, bound)
        b = jax.random.uniform(kb, (1, fan_out), jnp.float32, -bound, bound)
        params += [w, b]
    return tuple(params)


def critic_ref(state, action, params):
    """Pure-JAX reference for correctness checking (faithful to the PyTorch module)."""
    w1, b1, w2, b2, w3, b3 = params
    x = jnp.concatenate([state, action], axis=1)
    x = jnp.maximum(x @ w1 + b1, 0.0)
    x = jnp.maximum(x @ w2 + b2, 0.0)
    return x @ w3 + b3


if __name__ == "__main__":
    key = jax.random.PRNGKey(0)
    k_params, k_state, k_action = jax.random.split(key, 3)

    batch = 8
    state_dim = 16
    action_dim = 8
    hidden_size = 64

    params = init_critic_params(k_params, state_dim, action_dim, hidden_size)
    state = jax.random.normal(k_state, (batch, state_dim), jnp.float32)
    action = jax.random.normal(k_action, (batch, action_dim), jnp.float32)

    expected = critic_ref(state, action, params)

    # f32-resident weights: tight check against the pure-JAX reference
    # (tolerance leaves room for MXU default-precision vs exact-f32 fc3 path).
    out_f32 = critic_forward(
        state, action, prepare_critic_params(params, param_dtype=jnp.float32))
    out_f32 = jax.block_until_ready(out_f32)
    assert out_f32.shape == (batch, 1), out_f32.shape
    assert jnp.allclose(out_f32, expected, atol=5e-3, rtol=1e-2), \
        "f32 kernel mismatch vs reference"

    # Default (bf16-resident weights) path: tolerance sized for bf16 storage.
    out_bf16 = critic_forward(state, action, prepare_critic_params(params))
    out_bf16 = jax.block_until_ready(out_bf16)
    assert out_bf16.shape == (batch, 1), out_bf16.shape
    assert jnp.allclose(out_bf16, expected, atol=3e-2, rtol=3e-2), \
        "bf16 kernel mismatch vs reference"

    print("KERNEL_OK")
</pallas_src>

<mosaic_0001>
module attributes {stable_mosaic.version = 11 : i64} {
  func.func @_critic_kernel(%arg0: i32, %arg1: memref<8x16xf32, #tpu.memory_space<vmem>>, %arg2: memref<8x8xf32, #tpu.memory_space<vmem>>, %arg3: memref<24x64xf32, #tpu.memory_space<vmem>>, %arg4: memref<64x64xf32, #tpu.memory_space<vmem>>, %arg5: memref<8x128xf32, #tpu.memory_space<vmem>>, %arg6: memref<8x1xf32, #tpu.memory_space<vmem>>, %arg7: memref<8x24xf32, #tpu.memory_space<vmem>>) attributes {dimension_semantics = [#tpu.dimension_semantics<parallel>], iteration_bounds = array<i64: 1>, scalar_prefetch = 0 : i64, scratch_operands = 1 : i64, tpu.core_type = #tpu.core_type<tc>, window_params = [{transform_indices = @transform_0, window_bounds = array<i64: 8, 16>}, {transform_indices = @transform_1, window_bounds = array<i64: 8, 8>}, {pipeline_mode = #tpu.pipeline_mode<synchronous>, transform_indices = @transform_2, window_bounds = array<i64: 24, 64>}, {pipeline_mode = #tpu.pipeline_mode<synchronous>, transform_indices = @transform_3, window_bounds = array<i64: 64, 64>}, {pipeline_mode = #tpu.pipeline_mode<synchronous>, transform_indices = @transform_4, window_bounds = array<i64: 8, 128>}, {transform_indices = @transform_5, window_bounds = array<i64: 8, 1>}]} {
    %c0 = arith.constant 0 : index
    %c0_0 = arith.constant 0 : index
    %0 = vector.load %arg1[%c0, %c0_0] : memref<8x16xf32, #tpu.memory_space<vmem>>, vector<8x16xf32>
    %c0_1 = arith.constant 0 : index
    %c0_2 = arith.constant 0 : index
    %1 = vector.load %arg7[%c0_1, %c0_2] : memref<8x24xf32, #tpu.memory_space<vmem>>, vector<8x16xf32>
    tpu.vector_store %arg7[%c0_1, %c0_2], %0 {strides = array<i32>} : memref<8x24xf32, #tpu.memory_space<vmem>>, vector<8x16xf32>,
    %c0_3 = arith.constant 0 : index
    %c0_4 = arith.constant 0 : index
    %2 = vector.load %arg2[%c0_3, %c0_4] : memref<8x8xf32, #tpu.memory_space<vmem>>, vector<8x8xf32>
    %c0_5 = arith.constant 0 : index
    %c16 = arith.constant 16 : index
    %3 = vector.load %arg7[%c0_5, %c16] : memref<8x24xf32, #tpu.memory_space<vmem>>, vector<8x8xf32>
    tpu.vector_store %arg7[%c0_5, %c16], %2 {strides = array<i32>} : memref<8x24xf32, #tpu.memory_space<vmem>>, vector<8x8xf32>,
    %c0_6 = arith.constant 0 : index
    %c0_7 = arith.constant 0 : index
    %4 = vector.load %arg7[%c0_6, %c0_7] : memref<8x24xf32, #tpu.memory_space<vmem>>, vector<8x24xf32>
    %c0_8 = arith.constant 0 : index
    %c0_9 = arith.constant 0 : index
    %5 = vector.load %arg3[%c0_8, %c0_9] : memref<24x64xf32, #tpu.memory_space<vmem>>, vector<24x64xf32>
    %cst = arith.constant dense<0.000000e+00> : vector<8x64xf32>
    %6 = tpu.matmul %4, %5, %cst {dimension_numbers = #tpu.dot_dimension_numbers<[1], [0], [0], [1], [0, 0, 1, 1], [], []>} : vector<8x24xf32>, vector<24x64xf32>, vector<8x64xf32> -> vector<8x64xf32>
    %c0_10 = arith.constant 0 : index
    %c0_11 = arith.constant 0 : index
    %7 = vector.load %arg5[%c0_10, %c0_11] : memref<8x128xf32, #tpu.memory_space<vmem>>, vector<1x64xf32>
    %8 = vector.broadcast %7 : vector<1x64xf32> to vector<8x64xf32>
    %9 = arith.addf %6, %8 : vector<8x64xf32>
    %cst_12 = arith.constant 0.000000e+00 : f32
    %10 = vector.broadcast %cst_12 : f32 to vector<8x64xf32>
    %11 = arith.maximumf %9, %10 : vector<8x64xf32>
    %c0_13 = arith.constant 0 : index
    %c0_14 = arith.constant 0 : index
    %12 = vector.load %arg4[%c0_13, %c0_14] : memref<64x64xf32, #tpu.memory_space<vmem>>, vector<64x64xf32>
    %cst_15 = arith.constant dense<0.000000e+00> : vector<8x64xf32>
    %13 = tpu.matmul %11, %12, %cst_15 {dimension_numbers = #tpu.dot_dimension_numbers<[1], [0], [0], [1], [0, 0, 1, 1], [], []>} : vector<8x64xf32>, vector<64x64xf32>, vector<8x64xf32> -> vector<8x64xf32>
    %c1 = arith.constant 1 : index
    %c0_16 = arith.constant 0 : index
    %14 = vector.load %arg5[%c1, %c0_16] : memref<8x128xf32, #tpu.memory_space<vmem>>, vector<1x64xf32>
    %15 = vector.broadcast %14 : vector<1x64xf32> to vector<8x64xf32>
    %16 = arith.addf %13, %15 : vector<8x64xf32>
    %cst_17 = arith.constant 0.000000e+00 : f32
    %17 = vector.broadcast %cst_17 : f32 to vector<8x64xf32>
    %18 = arith.maximumf %16, %17 : vector<8x64xf32>
    %c2 = arith.constant 2 : index
    %c0_18 = arith.constant 0 : index
    %19 = vector.load %arg5[%c2, %c0_18] : memref<8x128xf32, #tpu.memory_space<vmem>>, vector<1x64xf32>
    %20 = vector.broadcast %19 : vector<1x64xf32> to vector<8x64xf32>
    %21 = arith.mulf %18, %20 : vector<8x64xf32>
    %cst_19 = arith.constant dense<0.000000e+00> : vector<8xf32>
    %22 = vector.multi_reduction <add>, %21, %cst_19 [1] : vector<8x64xf32> to vector<8xf32>
    %23 = vector.shape_cast %22 : vector<8xf32> to vector<8x1xf32>
    %c3 = arith.constant 3 : index
    %c0_20 = arith.constant 0 : index
    %24 = vector.load %arg5[%c3, %c0_20] : memref<8x128xf32, #tpu.memory_space<vmem>>, vector<1x1xf32>
    %25 = vector.broadcast %24 : vector<1x1xf32> to vector<8x1xf32>
    %26 = arith.addf %23, %25 : vector<8x1xf32>
    %c0_21 = arith.constant 0 : index
    %c0_22 = arith.constant 0 : index
    %27 = vector.load %arg6[%c0_21, %c0_22] : memref<8x1xf32, #tpu.memory_space<vmem>>, vector<8x1xf32>
    tpu.vector_store %arg6[%c0_21, %c0_22], %26 {strides = array<i32>} : memref<8x1xf32, #tpu.memory_space<vmem>>, vector<8x1xf32>,
    return
  }
  func.func @transform_0(%arg0: i32) -> (i32, i32) {
    %c0_i32 = arith.constant 0 : i32
    %c0_i32_0 = arith.constant 0 : i32
    return %arg0, %c0_i32 : i32, i32
  }
  func.func @transform_1(%arg0: i32) -> (i32, i32) {
    %c0_i32 = arith.constant 0 : i32
    %c0_i32_0 = arith.constant 0 : i32
    return %arg0, %c0_i32 : i32, i32
  }
  func.func @transform_2(%arg0: i32) -> (i32, i32) {
    %c0_i32 = arith.constant 0 : i32
    %c0_i32_0 = arith.constant 0 : i32
    %c0_i32_1 = arith.constant 0 : i32
    return %c0_i32, %c0_i32_0 : i32, i32
  }
  func.func @transform_3(%arg0: i32) -> (i32, i32) {
    %c0_i32 = arith.constant 0 : i32
    %c0_i32_0 = arith.constant 0 : i32
    %c0_i32_1 = arith.constant 0 : i32
    return %c0_i32, %c0_i32_0 : i32, i32
  }
  func.func @transform_4(%arg0: i32) -> (i32, i32) {
    %c0_i32 = arith.constant 0 : i32
    %c0_i32_0 = arith.constant 0 : i32
    %c0_i32_1 = arith.constant 0 : i32
    return %c0_i32, %c0_i32_0 : i32, i32
  }
  func.func @transform_5(%arg0: i32) -> (i32, i32) {
    %c0_i32 = arith.constant 0 : i32
    %c0_i32_0 = arith.constant 0 : i32
    return %arg0, %c0_i32 : i32, i32
  }
}

</mosaic_0001>

<bundles_post_ra>
// kernel: tpu_custom_call.1
= control target key start
LH: loop header
LB: loop body
LE: loop exit
PB: predicated region body
PF: predicated region fallthrough
CT: control target
= control target key end

     0   :  { %10 = vsyncpa [#allocation4], 0  ;;  %s509_s0 = inlined_call_operand.hbm [shape: f32[8,16], index: 0, kind: input, shape index: {}]   ;;  %s510_s1 = inlined_call_operand.hbm [shape: f32[8,8], index: 1, kind: input, shape index: {}]   ;;  %s511_s2 = inlined_call_operand.hbm [shape: f32[24,64], index: 2, kind: input, shape index: {}]   ;;  %s512_s3 = inlined_call_operand.hbm [shape: f32[64,64], index: 3, kind: input, shape index: {}]   ;;  %s513_s4 = inlined_call_operand.hbm [shape: f32[8,128], index: 4, kind: input, shape index: {}]   ;;  %s514_s5 = inlined_call_operand.vmem [shape: f32[8,1], index: 5, kind: output, shape index: {}]  }
   0x1   :  { %11 = vsyncpa [#allocation6], 0 }
   0x2   :  { %12 = vsyncpa [#allocation9], 0  ;;  %s451_s18 = smov [#allocation5]  }
   0x3   :  { %s29_s19 = sshll.u32 %s451_s18, 4  ;;  %s30_s19 = int_to_ptr.vmem [resolvable:$true] %s29_s19 }
   0x4   :  { %s353_s20 = scalar_lea.vmem %s30_s19, 128  ;;  %p358_p1 = scmp.lt.s32.totalorder %s30_s19, %s30_s19 }
   0x5   :  { %p354_p0 = scmp.ne.s32.totalorder %s30_s19, %s353_s20  ;;  %p359_p2 = scmp.lt.s32.totalorder %s353_s20, %s353_s20 }
   0x7   :  { %p360_p3 = por %p359_p2, %p358_p1 }
   0x9   :  { %p361_p4 = pnand %p360_p3, %p354_p0 }
   0xb   :  { %364 = shalt.err (!%p361_p4)
}
   0xc   :  { %32 = dma.hbm_to_vmem [thread:$0]  %s510_s1, 128, %s30_s19, [#allocation6]  }
   0xd   :  { %s452_s23 = smov [#allocation8]   ;;  %s453_s25 = smov [#allocation3]  }
   0xe   :  { %s50_s24 = sshll.u32 %s452_s23, 4  ;;  %s19_s26 = sshll.u32 %s453_s25, 4  ;;  %s51_s24 = int_to_ptr.vmem [resolvable:$true] %s50_s24  ;;  %s20_s26 = int_to_ptr.vmem [resolvable:$true] %s19_s26 }
   0xf   :  { %s373_s27 = scalar_lea.vmem %s51_s24, 1024  ;;  %p378_p6 = scmp.lt.s32.totalorder %s51_s24, %s51_s24 }
  0x10   :  { %p374_p5 = scmp.ne.s32.totalorder %s51_s24, %s373_s27  ;;  %p379_p7 = scmp.lt.s32.totalorder %s373_s27, %s373_s27 }
  0x12   :  { %p380_p8 = por %p379_p7, %p378_p6 }
  0x14   :  { %p381_p9 = pnand %p380_p8, %p374_p5 }
  0x16   :  { %384 = shalt.err (!%p381_p9)
}
  0x17   :  { %s454_s28 = smov 128   ;;  %s455_s29 = smov 8  }
  0x18   :  { %56 = dma.hbm_to_vmem [thread:$0]  %s512_s3, 1024, %s51_s24, [#allocation9], %s454_s28, %s454_s28, %s455_s29  }
  0x19   :  { %s393_s1 = scalar_lea.vmem %s20_s26, 128  ;;  %p398_p11 = scmp.lt.s32.totalorder %s20_s26, %s20_s26 }
  0x1a   :  { %p394_p10 = scmp.ne.s32.totalorder %s20_s26, %s393_s1  ;;  %p399_p12 = scmp.lt.s32.totalorder %s393_s1, %s393_s1 }
  0x1c   :  { %p400_p13 = por %p399_p12, %p398_p11 }
  0x1e   :  { %p401_p0 = pnand %p400_p13, %p394_p10 }
  0x20   :  { %404 = shalt.err (!%p401_p0)
}
  0x21   :  { %22 = dma.hbm_to_vmem [thread:$0]  %s509_s0, 128, %s20_s26, [#allocation4]  }
  0x22   :  { %s456_s9 = smov [#allocation7]   ;;  %s457_s11 = smov [#allocation10]  }
  0x23   :  { %s38_s10 = sshll.u32 %s456_s9, 4  ;;  %s63_s12 = sshll.u32 %s457_s11, 4  ;;  %s39_s10 = int_to_ptr.vmem [resolvable:$true] %s38_s10  ;;  %s64_s12 = int_to_ptr.vmem [resolvable:$true] %s63_s12 }
  0x24   :  { %s413_s13 = scalar_lea.vmem %s39_s10, 384  ;;  %p418_p2 = scmp.lt.s32.totalorder %s39_s10, %s39_s10 }
  0x25   :  { %p414_p1 = scmp.ne.s32.totalorder %s39_s10, %s413_s13  ;;  %p419_p3 = scmp.lt.s32.totalorder %s413_s13, %s413_s13 }
  0x27   :  { %p420_p4 = por %p419_p3, %p418_p2 }
  0x29   :  { %p421_p5 = pnand %p420_p4, %p414_p1 }
  0x2b   :  { %424 = shalt.err (!%p421_p5)
}
  0x2c   :  { %44 = dma.hbm_to_vmem [thread:$0]  %s511_s2, 384, %s39_s10, [#allocation6], %s454_s28, %s454_s28, %s455_s29  }
  0x2d   :  { %s433_s15 = scalar_lea.vmem %s64_s12, 128  ;;  %p438_p7 = scmp.lt.s32.totalorder %s64_s12, %s64_s12 }
  0x2e   :  { %p434_p6 = scmp.ne.s32.totalorder %s64_s12, %s433_s15  ;;  %p439_p8 = scmp.lt.s32.totalorder %s433_s15, %s433_s15 }
  0x30   :  { %p440_p9 = por %p439_p8, %p438_p7 }
  0x32   :  { %p441_p10 = pnand %p440_p9, %p434_p6 }
  0x34   :  { %444 = shalt.err (!%p441_p10)
}
  0x35   :  { %66 = dma.hbm_to_vmem [thread:$0]  %s513_s4, 128, %s64_s12, [#allocation9]  }
  0x36   :  { %445 = dma.done.wait [#allocation4], 128  }
  0x37   :  { %446 = vsyncadd [#allocation4], 4294967168 }
  0x38   :  { %447 = dma.done.wait [#allocation6], 512  }
  0x39   :  { %448 = vsyncadd [#allocation6], 4294966784 }
  0x3a   :  { %449 = dma.done.wait [#allocation9], 1152  }
  0x3b   :  { %450 = vsyncadd [#allocation9], 4294966144  ;;  %v458_v0 = vmov 0.0   ;;  %vm459_vm0 = vmmov 0   ;;  %vm83_vm1 = vcmask 130048   ;;  %v85_v1 = vld [vmem:[#allocation5] sm:$0xff] }
  0x3c   :  { %307 = vmatprep.subr.mxu0 %v458_v0  ;;  %316 = vmatprep.subr.mxu1 %v458_v0  ;;  %v82_v2 = vld [vmem:[#allocation3] sm:$0xff]  ;;  %s460_s2 = smov 16   ;;  %v94_v4 = vld [vmem:[#allocation7 + $0x8] sm:$0xff]  ;;  %v93_v6 = vld [vmem:[#allocation7] sm:$0xff]  ;;  %vm90_vm2 = vcmask 195712   ;;  %vm101_vm3 = vcmask 195584  }
  0x3d   :  { %313 = vmatprep.mubr.msk.f32.mxu0 %vm459_vm0, %v458_v0  ;;  %332 = vmatprep.mubr.msk.f32.mxu1 %vm459_vm0, %v458_v0  ;;  %v95_v3 = vld [vmem:[#allocation7 + $0x10] sm:$0xff]  ;;  %84 = vst.msk [vmem:[#allocation2] sm:$0xff] %vm83_vm1, %v82_v2  ;;  %v182_v7 = vld [vmem:[#allocation8 + $0x30] sm:$0xff]  ;;  %v181_v8 = vld [vmem:[#allocation8 + $0x28] sm:$0xff]  ;;  %vm189_vm4 = vcmask 523264   ;;  %vm279_vm5 = vcmask 7168  }
  0x3e   :  { %87 = vrot.lane.b32.xlu0 %v85_v1, %s460_s2  ;;  %308 = vmatpush3.msra.mxu0 %v95_v3  ;;  %v183_v5 = vld [vmem:[#allocation8 + $0x38] sm:$0xff]  ;;  %v180_v9 = vld [vmem:[#allocation8 + $0x20] sm:$0xff]  ;;  %v178_v13 = vld [vmem:[#allocation8 + $0x10] sm:$0xff] }
  0x3f   :  { %309 = vmatprep.subr.mxu0 %v458_v0  ;;  %317 = vmatpush3.msra.mxu1 %v183_v5  ;;  %v179_v10 = vld [vmem:[#allocation8 + $0x18] sm:$0xff]  ;;  %v177_v14 = vld [vmem:[#allocation8 + $0x8] sm:$0xff]  ;;  %v176_v15 = vld [vmem:[#allocation8] sm:$0xff] }
  0x40   :  { %310 = vmatpush3.msra.mxu0 %v94_v4  ;;  %318 = vmatprep.subr.mxu1 %v458_v0  ;;  %v288_v16 = vld [vmem:[#allocation10] ss:$0 sm:$0xff]  ;;  %v290_v21 = vld [vmem:[#allocation10 + $0x1] ss:$0 sm:$0xff]  ;;  %v292_v25 = vld [vmem:[#allocation10 + $0x2] ss:$0 sm:$0xff] }
  0x41   :  { %311 = vmatprep.subr.mxu0 %v458_v0  ;;  %319 = vmatpush3.msra.mxu1 %v182_v7  ;;  %v293_v29 = vld [vmem:[#allocation10 + $0x3] ss:$0 sm:$0xff] }
  0x42   :  { %312 = vmatpush3.msra.mxu0 %v93_v6  ;;  %320 = vmatprep.subr.mxu1 %v458_v0 }
  0x43   :  { %321 = vmatpush3.msra.mxu1 %v181_v8 }
  0x44   :  { %322 = vmatprep.subr.mxu1 %v458_v0 }
  0x45   :  { %323 = vmatpush3.msra.mxu1 %v180_v9 }
  0x46   :  { %324 = vmatprep.subr.mxu1 %v458_v0 }
  0x47   :  { %325 = vmatpush3.msra.mxu1 %v179_v10 }
  0x48   :  { %326 = vmatprep.subr.mxu1 %v458_v0 }
  0x49   :  { %327 = vmatpush3.msra.mxu1 %v178_v13 }
  0x4a   :  { %328 = vmatprep.subr.mxu1 %v458_v0 }
  0x4b   :  { %329 = vmatpush3.msra.mxu1 %v177_v14 }
  0x4c   :  { %330 = vmatprep.subr.mxu1 %v458_v0 }
  0x4d   :  { %331 = vmatpush3.msra.mxu1 %v176_v15 }
  0xb0   :  { %v88_v11 = vpop.permute.xlu0 %87 }
  0xb1   :  { %91 = vst.msk [vmem:[#allocation2] sm:$0xff] %vm90_vm2, %v88_v11 }
  0xb8   :  { %v92_v12 = vld [vmem:[#allocation2] sm:$0xff] }
  0xb9   :  { %314 = vmatmul.mubr.msk.f32.vlgmr.msra.gmra.mxu0 %vm101_vm3, %v92_v12 }
 0x179   :  { %v171_v17 = vpop.f32.mrf.mxu0 }
 0x17a   :  { %v172_v18 = vadd.f32 %v288_v16, %v171_v17 }
 0x17b   :  { %v315_v19 = vpop.f32.mrf.mxu0 }
 0x17c   :  { %v175_v20 = vmax.f32 %v172_v18, 0.0 }
 0x17e   :  { %333 = vmatmul.mubr.msk.f32.vlgmr.msra.gmra.mxu1 %vm189_vm4, %v175_v20 }
 0x23e   :  { %v259_v22 = vpop.f32.mrf.mxu1 }
 0x23f   :  { %v260_v23 = vadd.f32 %v290_v21, %v259_v22 }
 0x240   :  { %v334_v24 = vpop.f32.mrf.mxu1 }
 0x241   :  { %v263_v26 = vmax.f32 %v260_v23, 0.0 }
 0x243   :  { %v269_v27 = vmul.f32 %v292_v25, %v263_v26 }
 0x245   :  { %v270_v28 = vsel %vm189_vm4, %v269_v27, 0.0 }
 0x246   :  { %271 = vadd.xlane.f32.xlu0 %v270_v28 }
 0x2cf   :  { %v272_v30 = vpop.xlane.xlu0 %271 }
 0x2d0   :  { %v278_v31 = vadd.f32 %v293_v29, %v272_v30 }
 0x2d2   :  { %280 = vst.msk [vmem:[%s514_s5] sm:$0xff] %vm279_vm5, %v278_v31 }
 0x2d3   :  { %285 = vsyncpa [#allocation4], 1 }
 0x2d4   :  { %286 = vsyncpa [#allocation6], 1 }
 0x2d5   :  { %287 = vsyncpa [#allocation9], 1 }

</bundles_post_ra>
